<compile_context>
chip_gen: v6e
topology: v6e:2x2x1
jax: 0.10.0
libtpu: 0.0.40
codegen_flags: <defaults>
</compile_context>

<pallas_src>
import math

import jax
import jax.numpy as jnp
from jax.experimental import pallas as pl
from jax.experimental.pallas import tpu as pltpu


def _copy_kernel(x_ref, o_ref):
    # Pure lane-dense copy; no casts, no reshapes, no elementwise work.
    o_ref[...] = x_ref[...]


def _choose_tiling(total: int, itemsize: int):
    """Pick a lane-dense flat (rows, cols, tile_rows) view, or None."""
    cols = 0
    for cand in (1024, 512, 256, 128):  # wide lane dim -> unmasked vst
        if total % cand == 0:
            cols = cand
            break
    if cols == 0:
        return None
    rows = total // cols
    if rows <= 8:
        tile_rows = rows  # block == full extent; no sublane constraint
    else:
        # ~1 MiB per tile buffer; with input+output double-buffered this keeps
        # resident VMEM ~4 MiB (safe on v7x's 64 MiB physical / 32 MiB scoped).
        budget_rows = max(8, (1 << 20) // (cols * itemsize))
        tile_rows = min(rows, (budget_rows // 8) * 8)
    return rows, cols, tile_rows


def flatten(x: jax.Array) -> jax.Array:
    """Pallas equivalent of torch `batch.view([batch.shape[0], -1])`."""
    b = x.shape[0]
    flat_dim = math.prod(x.shape[1:]) if x.ndim > 1 else 1
    out2d = (b, flat_dim)
    total = b * flat_dim
    itemsize = jnp.dtype(x.dtype).itemsize

    tiling = _choose_tiling(total, itemsize)

    if tiling is None:
        # Fallback: element count not a multiple of 128.  Copy the (B, flat)
        # view as one full-array block (block shape == array shape is legal).
        x2 = jnp.reshape(x, out2d)  # free metadata reshape
        return pl.pallas_call(
            _copy_kernel,
            out_shape=jax.ShapeDtypeStruct(out2d, x.dtype),
            grid=(1,),
            in_specs=[pl.BlockSpec(out2d, lambda i: (0, 0))],
            out_specs=pl.BlockSpec(out2d, lambda i: (0, 0)),
            compiler_params=pltpu.CompilerParams(
                dimension_semantics=("arbitrary",)
            ),
        )(x2)

    rows, cols, tile_rows = tiling
    # Free metadata reshape to a fully flat, lane-dense layout.
    xf = jnp.reshape(x, (rows, cols))

    out_flat = pl.pallas_call(
        _copy_kernel,
        out_shape=jax.ShapeDtypeStruct((rows, cols), x.dtype),
        grid=(pl.cdiv(rows, tile_rows),),
        in_specs=[pl.BlockSpec((tile_rows, cols), lambda i: (i, 0))],
        out_specs=pl.BlockSpec((tile_rows, cols), lambda i: (i, 0)),
        compiler_params=pltpu.CompilerParams(
            dimension_semantics=("parallel",)  # shards across v7x's 2 TCs
        ),
    )(xf)

    # Free metadata reshape back to (B, C*H*W).
    return jnp.reshape(out_flat, out2d)


if __name__ == "__main__":
    key = jax.random.PRNGKey(0)

    # Primary check: shapes implied by the module's typical use (NCHW).
    B, C, H, W = 2, 4, 16, 16
    x = jax.random.normal(key, (B, C, H, W), dtype=jnp.float32)
    out = jax.block_until_ready(flatten(x))
    ref = x.reshape(B, -1)
    assert out.shape == (B, C * H * W), out.shape
    assert out.dtype == x.dtype
    assert jnp.array_equal(out, ref), "mismatch vs reference flatten"

    # Secondary check: larger shape exercises the multi-tile pipelined path.
    k2 = jax.random.PRNGKey(1)
    x2 = jax.random.normal(k2, (4, 16, 128, 128), dtype=jnp.float32)
    out2 = jax.block_until_ready(flatten(x2))
    assert jnp.array_equal(out2, x2.reshape(4, -1)), "mismatch (tiled path)"

    # Secondary check: odd shape (total not a multiple of 128) -> fallback path.
    k3 = jax.random.PRNGKey(2)
    x3 = jax.random.normal(k3, (2, 3, 5, 7), dtype=jnp.float32)
    out3 = jax.block_until_ready(flatten(x3))
    assert jnp.array_equal(out3, x3.reshape(2, -1)), "mismatch (fallback path)"

    print("KERNEL_OK")
</pallas_src>

<mosaic_0001>
module attributes {stable_mosaic.version = 11 : i64} {
  func.func @_copy_kernel(%arg0: i32, %arg1: memref<2x1024xf32, #tpu.memory_space<vmem>>, %arg2: memref<2x1024xf32, #tpu.memory_space<vmem>>) attributes {dimension_semantics = [#tpu.dimension_semantics<parallel>], iteration_bounds = array<i64: 1>, scalar_prefetch = 0 : i64, scratch_operands = 0 : i64, tpu.core_type = #tpu.core_type<tc>, window_params = [{transform_indices = @transform_0, window_bounds = array<i64: 2, 1024>}, {transform_indices = @transform_1, window_bounds = array<i64: 2, 1024>}]} {
    %c0 = arith.constant 0 : index
    %c0_0 = arith.constant 0 : index
    %0 = vector.load %arg1[%c0, %c0_0] : memref<2x1024xf32, #tpu.memory_space<vmem>>, vector<2x1024xf32>
    %c0_1 = arith.constant 0 : index
    %c0_2 = arith.constant 0 : index
    %1 = vector.load %arg2[%c0_1, %c0_2] : memref<2x1024xf32, #tpu.memory_space<vmem>>, vector<2x1024xf32>
    tpu.vector_store %arg2[%c0_1, %c0_2], %0 {strides = array<i32>} : memref<2x1024xf32, #tpu.memory_space<vmem>>, vector<2x1024xf32>,
    return
  }
  func.func @transform_0(%arg0: i32) -> (i32, i32) {
    %c0_i32 = arith.constant 0 : i32
    %c0_i32_0 = arith.constant 0 : i32
    return %arg0, %c0_i32 : i32, i32
  }
  func.func @transform_1(%arg0: i32) -> (i32, i32) {
    %c0_i32 = arith.constant 0 : i32
    %c0_i32_0 = arith.constant 0 : i32
    return %arg0, %c0_i32 : i32, i32
  }
}

</mosaic_0001>

<bundles_post_ra>
// kernel: tpu_custom_call.1
= control target key start
LH: loop header
LB: loop body
LE: loop exit
PB: predicated region body
PF: predicated region fallthrough
CT: control target
= control target key end

     0   :  { %6 = vsyncpa [#allocation3], 0  ;;  %s104_s0 = inlined_call_operand.hbm [shape: f32[2,1024], index: 0, kind: input, shape index: {}]   ;;  %s105_s1 = inlined_call_operand.hbm [shape: f32[2,1024], index: 1, kind: output, shape index: {}]  }
   0x1   :  { %7 = vsyncpa [#allocation4], 0  ;;  %s86_s6 = smov [#allocation2]  }
   0x2   :  { %s14_s7 = sshll.u32 %s86_s6, 4  ;;  %s15_s7 = int_to_ptr.vmem [resolvable:$true] %s14_s7 }
   0x3   :  { %s50_s8 = scalar_lea.vmem %s15_s7, 256  ;;  %p55_p1 = scmp.lt.s32.totalorder %s15_s7, %s15_s7 }
   0x4   :  { %p51_p0 = scmp.ne.s32.totalorder %s15_s7, %s50_s8  ;;  %p56_p2 = scmp.lt.s32.totalorder %s50_s8, %s50_s8 }
   0x6   :  { %p57_p3 = por %p56_p2, %p55_p1 }
   0x8   :  { %p58_p4 = pnand %p57_p3, %p51_p0 }
   0xa   :  { %61 = shalt.err (!%p58_p4)
}
   0xb   :  { %17 = dma.hbm_to_vmem [thread:$0]  %s104_s0, 256, %s15_s7, [#allocation3]  }
   0xc   :  { %82 = dma.done.wait [#allocation3], 256  }
   0xd   :  { %83 = vsyncadd [#allocation3], 4294967040  ;;  %s87_s11 = smov [#allocation5]   ;;  %v21_v0 = vld [vmem:[#allocation2] sm:$0xff]  ;;  %v22_v1 = vld [vmem:[#allocation2 + $0x8] sm:$0xff] }
   0xe   :  { %s31_s12 = sshll.u32 %s87_s11, 4  ;;  %23 = vst [vmem:[#allocation5] sm:$0xff] %v21_v0  ;;  %24 = vst [vmem:[#allocation5 + $0x8] sm:$0xff] %v22_v1  ;;  %s32_s12 = int_to_ptr.vmem [resolvable:$true] %s31_s12 }
   0xf   :  { %s62_s13 = scalar_lea.vmem %s32_s12, 256  ;;  %p67_p6 = scmp.lt.s32.totalorder %s32_s12, %s32_s12 }
  0x10   :  { %p63_p5 = scmp.ne.s32.totalorder %s32_s12, %s62_s13  ;;  %p68_p7 = scmp.lt.s32.totalorder %s62_s13, %s62_s13 }
  0x12   :  { %p69_p8 = por %p68_p7, %p67_p6 }
  0x14   :  { %p70_p9 = pnand %p69_p8, %p63_p5 }
  0x16   :  { %73 = shalt.err (!%p70_p9)
}
  0x17   :  { %34 = dma.vmem_to_hbm [thread:$0]  %s32_s12, 256, %s105_s1, [#allocation4]  }
  0x18   :  { %84 = dma.done.wait [#allocation4], 256  }
  0x19   :  { %85 = vsyncadd [#allocation4], 4294967040 }
  0x1a   :  { %38 = vsyncpa [#allocation3], 1 }
  0x1b   :  { %39 = vsyncpa [#allocation4], 1 }

</bundles_post_ra>
